<compile_context>
chip_gen: v7x
topology: tpu7x:2x2x1
jax: 0.10.0
libtpu: 0.0.40
codegen_flags: <defaults>
</compile_context>

<pallas_src>
import functools

import jax
import jax.numpy as jnp
import numpy as np
from jax.experimental import pallas as pl
from jax.experimental.pallas import tpu as pltpu

EPS = 1e-5
HIGH = jax.lax.Precision.HIGHEST  # only used by the pure-JAX reference


# ----------------------------- Pallas kernel -------------------------------

def _bottleneck_kernel(x_ref, w1_ref, b1_ref, w2s_ref, b2s_ref,
                       w2t_ref, b2t_ref, w3_ref, b3_ref,
                       ms_ref, mt_ref, o_ref, *, shifts_s, shifts_t):
    """One grid step == one sample, fully fused. Layout: (channels, T*H*W)."""
    x = x_ref[0]                                              # (Cin, THW) bf16

    # --- conv1 (1x1x1) + bn1 + relu (f32 accumulate / f32 epilogue) ---
    a1 = jnp.dot(w1_ref[...], x, preferred_element_type=jnp.float32)
    a1 = jnp.maximum(a1 + b1_ref[...], 0.0)                   # (planes_p, THW)

    def tap_conv(act, w_ref, m_ref, shifts):
        # act: (C_stage, THW) f32.  Per tap: one XLU lane rotation, zero the
        # wrapped / out-of-bounds lanes with a compact (1, THW) mask row
        # (sublane-broadcast over channels), cast to bf16 and accumulate one
        # MXU matmul.  No im2col intermediates are materialized.
        acc = None
        for tap, shift in enumerate(shifts):
            v = act if shift == 0 else pltpu.roll(act, shift, 1)
            v = (v * m_ref[tap:tap + 1, :]).astype(jnp.bfloat16)
            d = jnp.dot(w_ref[tap], v, preferred_element_type=jnp.float32)
            acc = d if acc is None else acc + d
        return acc

    # --- conv2_s (1x3x3, pad (0,1,1)) + bn2_s + relu ---
    a2 = jnp.maximum(tap_conv(a1, w2s_ref, ms_ref, shifts_s) + b2s_ref[...], 0.0)

    # --- conv2_t (3x1x1, pad (1,0,0)) + bn2_t + relu ---
    a3 = jnp.maximum(tap_conv(a2, w2t_ref, mt_ref, shifts_t) + b2t_ref[...], 0.0)

    # --- conv3 (1x1x1) + bn3 + identity residual + relu ---
    y = jnp.dot(w3_ref[...], a3.astype(jnp.bfloat16),
                preferred_element_type=jnp.float32)
    o_ref[0] = jnp.maximum(y + b3_ref[...] + x.astype(jnp.float32), 0.0)


# ----------------------------- helpers --------------------------------------

def _round_up(x, m):
    return (x + m - 1) // m * m


def _fold_bn(bn):
    gamma, beta, mean, var = bn
    scale = gamma / jnp.sqrt(var + EPS)
    return scale, beta - mean * scale


def _tap_masks(T, H, W):
    # Compact masks: one row per tap (NOT channel-replicated); 1.0 where the
    # shifted input position lies inside the un-padded volume.
    HW, THW = H * W, T * H * W
    i = jnp.arange(THW)
    t, h, w = i // HW, (i % HW) // W, i % W
    sm = [((h + oh >= 0) & (h + oh < H) & (w + ow >= 0) & (w + ow < W))
          for oh in (-1, 0, 1) for ow in (-1, 0, 1)]
    tm = [((t + ot >= 0) & (t + ot < T)) for ot in (-1, 0, 1)]
    return (jnp.stack(sm).astype(jnp.float32),      # (9, THW)
            jnp.stack(tm).astype(jnp.float32))      # (3, THW)


@functools.lru_cache(maxsize=None)
def _roll_matches_numpy():
    # Pin pltpu.roll's rotate direction against jnp.roll semantics
    # (result[i] = x[i - shift]) with a one-off 1-vreg probe, so the tap
    # ordering baked into weights/masks can never silently flip.
    def probe(x_ref, o_ref):
        o_ref[...] = pltpu.roll(x_ref[...], 1, 1)

    row = jnp.arange(128, dtype=jnp.float32)
    x = jnp.tile(row[None, :], (8, 1))
    y = pl.pallas_call(
        probe, out_shape=jax.ShapeDtypeStruct((8, 128), jnp.float32))(x)
    return bool(y[0, 0] == 127.0)


# ----------------------------- wrapper ---------------------------------------

def bottleneck_forward(x_ncthw, params):
    return _forward(x_ncthw, params, _roll_matches_numpy())


@functools.partial(jax.jit, static_argnums=(2,))
def _forward(x_ncthw, params, roll_numpy):
    N, Cin, T, H, W = x_ncthw.shape
    HW, THW = H * W, T * H * W
    planes = params["w1"].shape[1]
    mid = params["w2s"].shape[2]
    assert params["w3"].shape[1] == Cin   # identity residual (downsample=None)
    planes_p = _round_up(planes, 8)
    mid_p = _round_up(mid, 8)
    bf = jnp.bfloat16

    s1, b1 = _fold_bn(params["bn1"])
    s2s, b2s = _fold_bn(params["bn2_s"])
    s2t, b2t = _fold_bn(params["bn2_t"])
    s3, b3 = _fold_bn(params["bn3"])

    # conv1 weight (planes_p, Cin), BN scale folded into rows, bf16 for the MXU.
    w1m = jnp.pad(params["w1"].T * s1[:, None],
                  ((0, planes_p - planes), (0, 0))).astype(bf)
    b1v = jnp.pad(b1, (0, planes_p - planes)).reshape(planes_p, 1)

    # conv2_s per-tap weights (9, mid_p, planes_p); tap t <-> (oh,ow)=(t//3-1, t%3-1)
    w2 = jnp.transpose(params["w2s"], (0, 2, 1))                  # (9, mid, planes)
    w2 = jnp.pad(w2, ((0, 0), (0, mid_p - mid), (0, planes_p - planes)))
    w2m = (w2 * jnp.pad(s2s, (0, mid_p - mid))[None, :, None]).astype(bf)
    b2v = jnp.pad(b2s, (0, mid_p - mid)).reshape(mid_p, 1)

    # conv2_t per-tap weights (3, planes_p, mid_p); tap t <-> ot = t-1
    wt = jnp.transpose(params["w2t"], (0, 2, 1))                  # (3, planes, mid)
    wt = jnp.pad(wt, ((0, 0), (0, planes_p - planes), (0, mid_p - mid)))
    wtm = (wt * jnp.pad(s2t, (0, planes_p - planes))[None, :, None]).astype(bf)
    btv = jnp.pad(b2t, (0, planes_p - planes)).reshape(planes_p, 1)

    # conv3 weight (Cin, planes_p)
    w3m = (jnp.pad(params["w3"].T, ((0, 0), (0, planes_p - planes)))
           * s3[:, None]).astype(bf)
    b3v = b3.reshape(Cin, 1)

    mask_s, mask_t = _tap_masks(T, H, W)           # compact (9,THW) / (3,THW)

    # free reshape; lane dim = T*H*W (lane dense); bf16 halves the HBM read.
    x2 = x_ncthw.reshape(N, Cin, THW).astype(bf)

    # shifted[:, i] = act[:, i + off]  (wrapped lanes are zeroed by the masks)
    sgn = -1 if roll_numpy else 1
    shifts_s = tuple((sgn * (oh * W + ow)) % THW
                     for oh in (-1, 0, 1) for ow in (-1, 0, 1))
    shifts_t = tuple((sgn * (ot * HW)) % THW for ot in (-1, 0, 1))

    kernel = functools.partial(_bottleneck_kernel,
                               shifts_s=shifts_s, shifts_t=shifts_t)
    full = lambda a: pl.BlockSpec(a.shape, lambda i: (0,) * a.ndim)
    out = pl.pallas_call(
        kernel,
        out_shape=jax.ShapeDtypeStruct((N, Cin, THW), jnp.float32),
        grid=(N,),
        in_specs=[pl.BlockSpec((1, Cin, THW), lambda i: (i, 0, 0)),
                  full(w1m), full(b1v), full(w2m), full(b2v),
                  full(wtm), full(btv), full(w3m), full(b3v),
                  full(mask_s), full(mask_t)],
        out_specs=pl.BlockSpec((1, Cin, THW), lambda i: (i, 0, 0)),
        compiler_params=pltpu.CompilerParams(
            # one sample per grid step; an even N keeps both v7x TCs busy.
            dimension_semantics=("parallel",)),
    )(x2, w1m, b1v, w2m, b2v, wtm, btv, w3m, b3v, mask_s, mask_t)
    return out.reshape(N, Cin, T, H, W)


# ------------------------- pure-JAX reference --------------------------------

def reference_forward(x_ncthw, params):
    x = jnp.transpose(x_ncthw, (0, 2, 3, 4, 1))
    dn = ("NDHWC", "DHWIO", "NDHWC")

    def conv(v, k, pad):
        return jax.lax.conv_general_dilated(v, k, (1, 1, 1), pad,
                                            dimension_numbers=dn,
                                            precision=HIGH)

    def bn(v, p, relu=True):
        g, be, m, var = p
        v = (v - m) / jnp.sqrt(var + EPS) * g + be
        return jnp.maximum(v, 0.0) if relu else v

    in_planes, planes = params["w1"].shape
    mid = params["w2s"].shape[2]
    k1 = params["w1"].reshape(1, 1, 1, in_planes, planes)
    k2s = params["w2s"].reshape(3, 3, planes, mid)[None]
    k2t = params["w2t"].reshape(3, 1, 1, mid, planes)
    k3 = params["w3"].reshape(1, 1, 1, planes, in_planes)

    out = bn(conv(x, k1, "VALID"), params["bn1"])
    out = bn(conv(out, k2s, ((0, 0), (1, 1), (1, 1))), params["bn2_s"])
    out = bn(conv(out, k2t, ((1, 1), (0, 0), (0, 0))), params["bn2_t"])
    out = bn(conv(out, k3, "VALID"), params["bn3"], relu=False)
    out = jnp.maximum(out + x, 0.0)
    return jnp.transpose(out, (0, 4, 1, 2, 3))


# --------------------------------- main ---------------------------------------

if __name__ == "__main__":
    key = jax.random.PRNGKey(0)
    N, T, H, W = 2, 4, 8, 8
    planes = 8
    in_planes = planes * 4  # identity residual requires in_planes == planes*expansion
    n_3d = planes * planes * 3 * 3 * 3
    n_2p1d = planes * 3 * 3 + 3 * planes
    mid_planes = n_3d // n_2p1d  # = 18 for planes=8

    ks = jax.random.split(key, 9)
    x = jax.random.normal(ks[0], (N, in_planes, T, H, W), jnp.float32)

    def bn_params(k, c):
        k1, k2, k3, k4 = jax.random.split(k, 4)
        gamma = jax.random.uniform(k1, (c,), minval=0.5, maxval=1.5)
        beta = 0.1 * jax.random.normal(k2, (c,))
        mean = 0.1 * jax.random.normal(k3, (c,))
        var = jax.random.uniform(k4, (c,), minval=0.5, maxval=1.5)
        return gamma, beta, mean, var

    params = {
        # weights stored channels-last style: (Cin, Cout) / (taps, Cin, Cout)
        "w1": 0.1 * jax.random.normal(ks[1], (in_planes, planes), jnp.float32),
        "bn1": bn_params(ks[2], planes),
        "w2s": 0.1 * jax.random.normal(ks[3], (9, planes, mid_planes), jnp.float32),
        "bn2_s": bn_params(ks[4], mid_planes),
        "w2t": 0.1 * jax.random.normal(ks[5], (3, mid_planes, planes), jnp.float32),
        "bn2_t": bn_params(ks[6], planes),
        "w3": 0.1 * jax.random.normal(ks[7], (planes, in_planes), jnp.float32),
        "bn3": bn_params(ks[8], in_planes),
    }

    out = jax.block_until_ready(bottleneck_forward(x, params))
    ref = jax.block_until_ready(reference_forward(x, params))
    assert out.shape == (N, in_planes, T, H, W)
    # Tolerance derived for bf16 MXU operands (rel rounding ~2^-9) across four
    # chained matmuls plus a bf16-cast residual: worst-element error estimate
    # ~1.5e-2, so 5e-2/5e-2 keeps >3x margin.  This assert also pins the
    # tap <-> weight <-> mask ordering of the per-tap accumulation (a mismatch
    # would blow far past the tolerance).
    np.testing.assert_allclose(np.asarray(out), np.asarray(ref),
                               rtol=5e-2, atol=5e-2)
    print("KERNEL_OK")
</pallas_src>

<mosaic_0001>
module attributes {stable_mosaic.version = 11 : i64} {
  func.func @probe(%arg0: memref<8x128xf32, #tpu.memory_space<vmem>>, %arg1: memref<8x128xf32, #tpu.memory_space<vmem>>) attributes {dimension_semantics = [], scalar_prefetch = 0 : i64, scratch_operands = 0 : i64, tpu.core_type = #tpu.core_type<tc>} {
    %c0 = arith.constant 0 : index
    %c0_0 = arith.constant 0 : index
    %0 = vector.load %arg0[%c0, %c0_0] : memref<8x128xf32, #tpu.memory_space<vmem>>, vector<8x128xf32>
    %c1_i32 = arith.constant 1 : i32
    %1 = tpu.dynamic_rotate %0 by %c1_i32 dim 1 : vector<8x128xf32>, i32 -> vector<8x128xf32>
    %c0_1 = arith.constant 0 : index
    %c0_2 = arith.constant 0 : index
    %2 = vector.load %arg1[%c0_1, %c0_2] : memref<8x128xf32, #tpu.memory_space<vmem>>, vector<8x128xf32>
    tpu.vector_store %arg1[%c0_1, %c0_2], %1 {strides = array<i32>} : memref<8x128xf32, #tpu.memory_space<vmem>>, vector<8x128xf32>,
    return
  }
}

</mosaic_0001>

<bundles_post_ra>
// kernel: tpu_custom_call.1
= control target key start
LH: loop header
LB: loop body
LE: loop exit
PB: predicated region body
PF: predicated region fallthrough
CT: control target
= control target key end

     0   :  { %6 = vsyncpa [#allocation3], 0  ;;  %s128_s0 = inlined_call_operand.hbm [shape: f32[8,128], index: 0, kind: input, shape index: {}]   ;;  %s129_s1 = inlined_call_operand.hbm [shape: f32[8,128], index: 1, kind: output, shape index: {}]  }
   0x1   :  { %7 = vsyncpa [#allocation4], 0  ;;  %s91_s6 = smov [#allocation2]   ;;  %s43_s10 = scalar_lea.hbm %s128_s0, 128 }
   0x2   :  { %s14_s7 = sshll.u32 %s91_s6, 4  ;;  %p44_p0 = scmp.ne.s32.totalorder %s128_s0, %s43_s10  ;;  %s15_s7 = int_to_ptr.vmem [resolvable:$true] %s14_s7 }
   0x3   :  { %p47_p1 = scmp.lt.u32.totalorder %s43_s10, %s128_s0 }
   0x5   :  { %p49_p2 = pnand %p47_p1, %p44_p0 }
   0x7   :  { %52 = shalt.err (!%p49_p2)
}
   0x8   :  { %s53_s15 = scalar_lea.vmem %s15_s7, 128  ;;  %p58_p4 = scmp.lt.s32.totalorder %s15_s7, %s15_s7 }
   0x9   :  { %p54_p3 = scmp.ne.s32.totalorder %s15_s7, %s53_s15  ;;  %p59_p5 = scmp.lt.s32.totalorder %s53_s15, %s53_s15 }
   0xb   :  { %p60_p6 = por %p59_p5, %p58_p4 }
   0xd   :  { %p61_p7 = pnand %p60_p6, %p54_p3 }
   0xf   :  { %64 = shalt.err (!%p61_p7)
}
  0x10   :  { %17 = dma.hbm_to_vmem [thread:$0]  %s128_s0, 128, %s15_s7, [#allocation3]  }
  0x11   :  { %87 = dma.done.wait [#allocation3], 128  }
  0x12   :  { %88 = vsyncadd [#allocation3], 4294967168  ;;  %v21_v0 = vld [vmem:[#allocation2] sm:$0xff]  ;;  %s92_s18 = smov 1   ;;  %s93_s19 = smov [#allocation5]  }
  0x13   :  { %22 = vrot.lane.b32.xlu0 %v21_v0, %s92_s18  ;;  %s31_s20 = sshll.u32 %s93_s19, 4  ;;  %s32_s20 = int_to_ptr.vmem [resolvable:$true] %s31_s20 }
  0x14   :  { %s65_s21 = scalar_lea.vmem %s32_s20, 128  ;;  %p70_p9 = scmp.lt.s32.totalorder %s32_s20, %s32_s20 }
  0x15   :  { %p66_p8 = scmp.ne.s32.totalorder %s32_s20, %s65_s21  ;;  %p71_p10 = scmp.lt.s32.totalorder %s65_s21, %s65_s21 }
  0x17   :  { %p72_p11 = por %p71_p10, %p70_p9 }
  0x19   :  { %p73_p12 = pnand %p72_p11, %p66_p8 }
  0x85   :  { %v23_v1 = vpop.permute.xlu0 %22 }
  0x86   :  { %24 = vst [vmem:[#allocation5] sm:$0xff] %v23_v1 }
  0x87   :  { %76 = shalt.err (!%p73_p12)
}
  0x88   :  { %s77_s0 = scalar_lea.hbm %s129_s1, 128 }
  0x89   :  { %p78_p13 = scmp.ne.s32.totalorder %s129_s1, %s77_s0  ;;  %p81_p0 = scmp.lt.u32.totalorder %s77_s0, %s129_s1 }
  0x8b   :  { %p83_p1 = pnand %p81_p0, %p78_p13 }
  0x8d   :  { %86 = shalt.err (!%p83_p1)
}
  0x8e   :  { %34 = dma.vmem_to_hbm [thread:$0]  %s32_s20, 128, %s129_s1, [#allocation4]  }
  0x8f   :  { %89 = dma.done.wait [#allocation4], 128  }
  0x90   :  { %90 = vsyncadd [#allocation4], 4294967168 }
  0x91   :  { %38 = vsyncpa [#allocation3], 1 }
  0x92   :  { %39 = vsyncpa [#allocation4], 1 }

</bundles_post_ra>
